<compile_context>
chip_gen: v6e
topology: v6e:2x2x1
jax: 0.10.0
libtpu: 0.0.40
codegen_flags: <defaults>
</compile_context>

<pallas_src>
import math
import jax
import jax.numpy as jnp
from jax.experimental import pallas as pl
from jax.experimental.pallas import tpu as pltpu

_INV_SQRT2 = 0.7071067811865476
_SQRT_2_OVER_PI = 0.7978845608028654


def _round_up(a, b):
    return (a + b - 1) // b * b


def _cdiv(a, b):
    return (a + b - 1) // b


def _tpu_info():
    """Best-effort (device_kind, vmem_capacity_bytes)."""
    kind = ""
    try:
        kind = jax.devices()[0].device_kind.lower()
    except Exception:
        pass
    vmem_cap = None
    try:
        vmem_cap = int(pltpu.get_tpu_info().vmem_capacity_bytes)
    except Exception:
        vmem_cap = None
    if not vmem_cap or vmem_cap <= 0:
        # v7x has 64 MiB / TensorCore; v4/v5e/v6e have 128 MiB.
        vmem_cap = (64 << 20) if "v7" in kind else (128 << 20)
    return kind, vmem_cap


def _pick_hidden_tile(hidden, target):
    """Largest 128-multiple divisor of hidden <= target (full hidden if small
    or hidden is not lane-divisible)."""
    if hidden <= target or hidden % 128 != 0:
        return hidden
    t = (target // 128) * 128
    while t >= 128:
        if hidden % t == 0:
            return t
        t -= 128
    return hidden


def _pick_row_tile(rows, dim, th, x_isz, w_isz, kind, vmem_limit):
    m_align = 128 if "v5" in kind else 256           # MXU tile (4x128^2 vs 2x256^2)
    tm_target = 1024 if "v6" in kind else 512        # roofline crossover targets
    # VMEM model: x/out double buffers + f32 accumulator scale with tm;
    # W1/W2/b1/b2 double buffers do not.
    budget = int(0.85 * vmem_limit)                  # headroom for compiler scratch
    fixed = 2 * 2 * dim * th * w_isz + 2 * (th + dim) * 4
    per_row = dim * (2 * x_isz + 2 * 4 + 4)          # x(2) + out(2, <=f32) + acc(f32)
    avail = budget - fixed
    tm = max(8, avail // per_row) if avail > 0 else 8
    tm = min(tm_target, tm)
    tm = (tm // m_align) * m_align if tm >= m_align else max(8, (tm // 8) * 8)
    # Cap by rows, keeping the block MXU-aligned when rows permit.
    rows_cap = _round_up(rows, m_align) if rows >= m_align else _round_up(rows, 8)
    tm = max(8, min(tm, rows_cap))
    # v7x: 2 TensorCores shard the "parallel" row axis -> ensure >= 2 steps.
    if "v7" in kind and rows > 8 and _cdiv(rows, tm) < 2:
        tm = max(8, _round_up(_cdiv(rows, 2), 8))
    return tm


def _make_ffn_kernel(approx_gelu):
    def kernel(x_ref, w1_ref, b1_ref, w2_ref, b2_ref, o_ref, acc_ref):
        # x_ref : (tm, dim)      w1_ref : (dim, th)   b1_ref : (1, th)
        # w2_ref: (th, dim)      b2_ref : (1, dim)
        # o_ref : (tm, dim)      acc_ref: (tm, dim) f32 scratch (resident over k)
        k = pl.program_id(1)

        @pl.when(k == 0)
        def _():
            acc_ref[...] = jnp.zeros_like(acc_ref)

        # fc1 (hidden tile) + bias, f32 accumulation on the MXU.
        h = jnp.dot(x_ref[...], w1_ref[...], preferred_element_type=jnp.float32)
        h = h + b1_ref[...].astype(jnp.float32)

        if approx_gelu:
            # tanh approximation: single EUP transcendental (free VLIW slot).
            h = 0.5 * h * (1.0 + jnp.tanh(_SQRT_2_OVER_PI * (h + 0.044715 * h * h * h)))
        else:
            # exact erf GELU, matching torch ACT2FN['gelu'].
            h = 0.5 * h * (1.0 + jax.lax.erf(h * _INV_SQRT2))

        # dropout with p=activation_dropout=0.0 (eval mode) is the identity.
        # TODO(synk): training-mode dropout (p>0) would need pltpu.prng_* masking.

        # fc2 partial product for this hidden tile; MXU fed in native weight dtype.
        acc_ref[...] += jnp.dot(h.astype(w2_ref.dtype), w2_ref[...],
                                preferred_element_type=jnp.float32)

        @pl.when(k == pl.num_programs(1) - 1)
        def _():
            o_ref[...] = (acc_ref[...] + b2_ref[...].astype(jnp.float32)).astype(o_ref.dtype)

    return kernel


def luca_ffn(x, w1, b1, w2, b2, *, tm=None, th=None, approx_gelu=False, mxu_dtype=None):
    """x: [..., dim]  w1: [dim, hidden]  b1: [hidden]  w2: [hidden, dim]  b2: [dim]"""
    orig_shape = x.shape
    out_dtype = x.dtype
    dim = orig_shape[-1]
    hidden = w1.shape[1]

    if mxu_dtype is not None:
        # Opt-in fast path: feed the MXU in (e.g.) bf16, keep f32 accumulation.
        x = x.astype(mxu_dtype)
        w1 = w1.astype(mxu_dtype)
        w2 = w2.astype(mxu_dtype)

    x2d = x.reshape(-1, dim)
    rows = x2d.shape[0]

    kind, vmem_cap = _tpu_info()
    vmem_limit = max(32 << 20, min(int(0.75 * vmem_cap), 100 << 20))

    x_isz = jnp.dtype(x2d.dtype).itemsize
    w_isz = jnp.dtype(w1.dtype).itemsize

    # Hidden tile (reduction axis).
    if th is None:
        th_eff = _pick_hidden_tile(hidden, 256)
    else:
        th_eff = th if hidden % th == 0 else _pick_hidden_tile(hidden, th)

    # Row tile (parallel axis).
    if tm is None:
        tm_eff = _pick_row_tile(rows, dim, th_eff, x_isz, w_isz, kind, vmem_limit)
    else:
        tm_eff = max(8, min(tm, _round_up(rows, 8)))

    grid = (_cdiv(rows, tm_eff), hidden // th_eff)

    b1_2d = b1.reshape(1, hidden)
    b2_2d = b2.reshape(1, dim)

    out_isz = jnp.dtype(out_dtype).itemsize
    weight_bytes = (w1.size * w_isz + w2.size * w_isz
                    + b1.size * jnp.dtype(b1.dtype).itemsize
                    + b2.size * jnp.dtype(b2.dtype).itemsize)
    cost = pl.CostEstimate(
        flops=4 * rows * dim * hidden,                 # two matmuls
        transcendentals=rows * hidden,                 # erf / tanh
        bytes_accessed=(grid[0] * weight_bytes         # W1/W2 re-streamed per row tile
                        + x2d.size * x_isz + rows * dim * out_isz),
    )

    out = pl.pallas_call(
        _make_ffn_kernel(approx_gelu),
        out_shape=jax.ShapeDtypeStruct((rows, dim), out_dtype),
        grid_spec=pltpu.PrefetchScalarGridSpec(
            num_scalar_prefetch=0,
            grid=grid,
            in_specs=[
                pl.BlockSpec((tm_eff, dim), lambda i, k: (i, 0)),   # x row tile (resident over k)
                pl.BlockSpec((dim, th_eff), lambda i, k: (0, k)),   # W1 hidden tile
                pl.BlockSpec((1, th_eff), lambda i, k: (0, k)),     # b1 hidden tile
                pl.BlockSpec((th_eff, dim), lambda i, k: (k, 0)),   # W2 hidden tile
                pl.BlockSpec((1, dim), lambda i, k: (0, 0)),        # b2 (resident)
            ],
            out_specs=pl.BlockSpec((tm_eff, dim), lambda i, k: (i, 0)),
            scratch_shapes=[pltpu.VMEM((tm_eff, dim), jnp.float32)],
        ),
        compiler_params=pltpu.CompilerParams(
            dimension_semantics=("parallel", "arbitrary"),
            vmem_limit_bytes=vmem_limit,
        ),
        cost_estimate=cost,
    )(x2d, w1, b1_2d, w2, b2_2d)

    return out.reshape(orig_shape[:-1] + (dim,)).astype(out_dtype)


def _reference_ffn(x, w1, b1, w2, b2):
    h = x @ w1 + b1
    h = 0.5 * h * (1.0 + jax.lax.erf(h * _INV_SQRT2))
    return h @ w2 + b2


def _make_params(key, dim, hidden, dtype=jnp.float32):
    kw1, kb1, kw2, kb2 = jax.random.split(key, 4)
    bound1 = 1.0 / math.sqrt(dim)
    bound2 = 1.0 / math.sqrt(hidden)
    # Stored already transposed: W1 [dim, hidden], W2 [hidden, dim]
    w1 = jax.random.uniform(kw1, (dim, hidden), minval=-bound1, maxval=bound1).astype(dtype)
    b1 = jax.random.uniform(kb1, (hidden,), minval=-bound1, maxval=bound1).astype(dtype)
    w2 = jax.random.uniform(kw2, (hidden, dim), minval=-bound2, maxval=bound2).astype(dtype)
    b2 = jax.random.uniform(kb2, (dim,), minval=-bound2, maxval=bound2).astype(dtype)
    return w1, b1, w2, b2


if __name__ == "__main__":
    key = jax.random.PRNGKey(0)
    k1, k2, k3, k4, k5, k6 = jax.random.split(key, 6)

    # Test 1: small shapes matching the module (single-tile path), f32.
    batch, seq, dim, hidden = 2, 8, 32, 64
    x = jax.random.normal(k1, (batch, seq, dim), dtype=jnp.float32)
    w1, b1, w2, b2 = _make_params(k2, dim, hidden)
    y = jax.block_until_ready(luca_ffn(x, w1, b1, w2, b2))
    y_ref = _reference_ffn(x.reshape(-1, dim), w1, b1, w2, b2).reshape(batch, seq, dim)
    assert jnp.allclose(y, y_ref, atol=1e-5, rtol=1e-5), "mismatch vs reference (test 1)"

    # Test 2: ragged row count (masked partial row blocks via cdiv grid, no pad)
    # + multi-step row axis + hidden-tiled reduction (2 k-steps).
    batch2, seq2, dim2, hidden2 = 2, 7, 32, 256
    x2 = jax.random.normal(k3, (batch2, seq2, dim2), dtype=jnp.float32)
    w1b, b1b, w2b, b2b = _make_params(k4, dim2, hidden2)
    y2 = jax.block_until_ready(luca_ffn(x2, w1b, b1b, w2b, b2b, tm=8, th=128))
    y2_ref = _reference_ffn(x2.reshape(-1, dim2), w1b, b1b, w2b, b2b).reshape(batch2, seq2, dim2)
    assert jnp.allclose(y2, y2_ref, atol=1e-5, rtol=1e-5), "mismatch vs reference (test 2)"

    # Test 3: bf16 operands (fast MXU path, f32 accumulation) vs f32 reference.
    batch3, seq3, dim3, hidden3 = 2, 8, 32, 128
    x3 = jax.random.normal(k5, (batch3, seq3, dim3), dtype=jnp.bfloat16)
    w1c, b1c, w2c, b2c = _make_params(k6, dim3, hidden3, dtype=jnp.bfloat16)
    y3 = jax.block_until_ready(luca_ffn(x3, w1c, b1c, w2c, b2c))
    y3_ref = _reference_ffn(x3.reshape(-1, dim3).astype(jnp.float32),
                            w1c.astype(jnp.float32), b1c.astype(jnp.float32),
                            w2c.astype(jnp.float32), b2c.astype(jnp.float32)
                            ).reshape(batch3, seq3, dim3)
    assert jnp.allclose(y3.astype(jnp.float32), y3_ref, atol=5e-2, rtol=5e-2), \
        "mismatch vs reference (test 3)"

    print("KERNEL_OK")
</pallas_src>

<mosaic_0001>
module attributes {stable_mosaic.version = 11 : i64} {
  func.func @kernel(%arg0: i32, %arg1: i32, %arg2: memref<16x32xf32, #tpu.memory_space<vmem>>, %arg3: memref<32x64xf32, #tpu.memory_space<vmem>>, %arg4: memref<1x64xf32, #tpu.memory_space<vmem>>, %arg5: memref<64x32xf32, #tpu.memory_space<vmem>>, %arg6: memref<1x32xf32, #tpu.memory_space<vmem>>, %arg7: memref<16x32xf32, #tpu.memory_space<vmem>>, %arg8: memref<16x32xf32, #tpu.memory_space<vmem>>) attributes {dimension_semantics = [#tpu.dimension_semantics<parallel>, #tpu.dimension_semantics<arbitrary>], iteration_bounds = array<i64: 1, 1>, scalar_prefetch = 0 : i64, scratch_operands = 1 : i64, tpu.core_type = #tpu.core_type<tc>, window_params = [{transform_indices = @transform_0, window_bounds = array<i64: 16, 32>}, {transform_indices = @transform_1, window_bounds = array<i64: 32, 64>}, {transform_indices = @transform_2, window_bounds = array<i64: 1, 64>}, {transform_indices = @transform_3, window_bounds = array<i64: 64, 32>}, {pipeline_mode = #tpu.pipeline_mode<synchronous>, transform_indices = @transform_4, window_bounds = array<i64: 1, 32>}, {transform_indices = @transform_5, window_bounds = array<i64: 16, 32>}]} {
    %c0_i32 = arith.constant 0 : i32
    %0 = arith.cmpi eq, %arg1, %c0_i32 : i32
    %1 = arith.extui %0 : i1 to i32
    %c0_i32_0 = arith.constant 0 : i32
    %2 = arith.cmpi ne, %1, %c0_i32_0 : i32
    scf.if %2 {
      %cst_18 = arith.constant 0.000000e+00 : f32
      %25 = vector.broadcast %cst_18 : f32 to vector<16x32xf32>
      %c0_19 = arith.constant 0 : index
      %c0_20 = arith.constant 0 : index
      %26 = vector.load %arg8[%c0_19, %c0_20] : memref<16x32xf32, #tpu.memory_space<vmem>>, vector<16x32xf32>
      tpu.vector_store %arg8[%c0_19, %c0_20], %25 {strides = array<i32>} : memref<16x32xf32, #tpu.memory_space<vmem>>, vector<16x32xf32>,
    } else {
    }
    %c0 = arith.constant 0 : index
    %c0_1 = arith.constant 0 : index
    %3 = vector.load %arg2[%c0, %c0_1] : memref<16x32xf32, #tpu.memory_space<vmem>>, vector<16x32xf32>
    %c0_2 = arith.constant 0 : index
    %c0_3 = arith.constant 0 : index
    %4 = vector.load %arg3[%c0_2, %c0_3] : memref<32x64xf32, #tpu.memory_space<vmem>>, vector<32x64xf32>
    %cst = arith.constant dense<0.000000e+00> : vector<16x64xf32>
    %5 = tpu.matmul %3, %4, %cst {dimension_numbers = #tpu.dot_dimension_numbers<[1], [0], [0], [1], [0, 0, 1, 1], [], []>} : vector<16x32xf32>, vector<32x64xf32>, vector<16x64xf32> -> vector<16x64xf32>
    %c0_4 = arith.constant 0 : index
    %c0_5 = arith.constant 0 : index
    %6 = vector.load %arg4[%c0_4, %c0_5] : memref<1x64xf32, #tpu.memory_space<vmem>>, vector<1x64xf32>
    %7 = vector.broadcast %6 : vector<1x64xf32> to vector<16x64xf32>
    %8 = arith.addf %5, %7 : vector<16x64xf32>
    %cst_6 = arith.constant 5.000000e-01 : f32
    %9 = vector.broadcast %cst_6 : f32 to vector<16x64xf32>
    %10 = arith.mulf %9, %8 : vector<16x64xf32>
    %cst_7 = arith.constant 0.707106769 : f32
    %11 = vector.broadcast %cst_7 : f32 to vector<16x64xf32>
    %12 = arith.mulf %8, %11 : vector<16x64xf32>
    %13 = math.erf %12 : vector<16x64xf32>
    %cst_8 = arith.constant 1.000000e+00 : f32
    %14 = vector.broadcast %cst_8 : f32 to vector<16x64xf32>
    %15 = arith.addf %14, %13 : vector<16x64xf32>
    %16 = arith.mulf %10, %15 : vector<16x64xf32>
    %c0_9 = arith.constant 0 : index
    %c0_10 = arith.constant 0 : index
    %17 = vector.load %arg8[%c0_9, %c0_10] : memref<16x32xf32, #tpu.memory_space<vmem>>, vector<16x32xf32>
    %c0_11 = arith.constant 0 : index
    %c0_12 = arith.constant 0 : index
    %18 = vector.load %arg5[%c0_11, %c0_12] : memref<64x32xf32, #tpu.memory_space<vmem>>, vector<64x32xf32>
    %cst_13 = arith.constant dense<0.000000e+00> : vector<16x32xf32>
    %19 = tpu.matmul %16, %18, %cst_13 {dimension_numbers = #tpu.dot_dimension_numbers<[1], [0], [0], [1], [0, 0, 1, 1], [], []>} : vector<16x64xf32>, vector<64x32xf32>, vector<16x32xf32> -> vector<16x32xf32>
    %20 = arith.addf %17, %19 : vector<16x32xf32>
    %c0_14 = arith.constant 0 : index
    %c0_15 = arith.constant 0 : index
    %21 = vector.load %arg8[%c0_14, %c0_15] : memref<16x32xf32, #tpu.memory_space<vmem>>, vector<16x32xf32>
    tpu.vector_store %arg8[%c0_14, %c0_15], %20 {strides = array<i32>} : memref<16x32xf32, #tpu.memory_space<vmem>>, vector<16x32xf32>,
    %c0_i32_16 = arith.constant 0 : i32
    %22 = arith.cmpi eq, %arg1, %c0_i32_16 : i32
    %23 = arith.extui %22 : i1 to i32
    %c0_i32_17 = arith.constant 0 : i32
    %24 = arith.cmpi ne, %23, %c0_i32_17 : i32
    scf.if %24 {
      %c0_18 = arith.constant 0 : index
      %c0_19 = arith.constant 0 : index
      %25 = vector.load %arg8[%c0_18, %c0_19] : memref<16x32xf32, #tpu.memory_space<vmem>>, vector<16x32xf32>
      %c0_20 = arith.constant 0 : index
      %c0_21 = arith.constant 0 : index
      %26 = vector.load %arg6[%c0_20, %c0_21] : memref<1x32xf32, #tpu.memory_space<vmem>>, vector<1x32xf32>
      %27 = vector.broadcast %26 : vector<1x32xf32> to vector<16x32xf32>
      %28 = arith.addf %25, %27 : vector<16x32xf32>
      %c0_22 = arith.constant 0 : index
      %c0_23 = arith.constant 0 : index
      %29 = vector.load %arg7[%c0_22, %c0_23] : memref<16x32xf32, #tpu.memory_space<vmem>>, vector<16x32xf32>
      tpu.vector_store %arg7[%c0_22, %c0_23], %28 {strides = array<i32>} : memref<16x32xf32, #tpu.memory_space<vmem>>, vector<16x32xf32>,
    } else {
    }
    return
  }
  func.func @transform_0(%arg0: i32, %arg1: i32) -> (i32, i32) {
    %c0_i32 = arith.constant 0 : i32
    %c0_i32_0 = arith.constant 0 : i32
    return %arg0, %c0_i32 : i32, i32
  }
  func.func @transform_1(%arg0: i32, %arg1: i32) -> (i32, i32) {
    %c0_i32 = arith.constant 0 : i32
    %c0_i32_0 = arith.constant 0 : i32
    return %c0_i32, %arg1 : i32, i32
  }
  func.func @transform_2(%arg0: i32, %arg1: i32) -> (i32, i32) {
    %c0_i32 = arith.constant 0 : i32
    %c0_i32_0 = arith.constant 0 : i32
    return %c0_i32, %arg1 : i32, i32
  }
  func.func @transform_3(%arg0: i32, %arg1: i32) -> (i32, i32) {
    %c0_i32 = arith.constant 0 : i32
    %c0_i32_0 = arith.constant 0 : i32
    return %arg1, %c0_i32 : i32, i32
  }
  func.func @transform_4(%arg0: i32, %arg1: i32) -> (i32, i32) {
    %c0_i32 = arith.constant 0 : i32
    %c0_i32_0 = arith.constant 0 : i32
    %c0_i32_1 = arith.constant 0 : i32
    return %c0_i32, %c0_i32_0 : i32, i32
  }
  func.func @transform_5(%arg0: i32, %arg1: i32) -> (i32, i32) {
    %c0_i32 = arith.constant 0 : i32
    %c0_i32_0 = arith.constant 0 : i32
    return %arg0, %c0_i32 : i32, i32
  }
}

</mosaic_0001>

<bundles_post_ra>
// kernel: tpu_custom_call.1
= control target key start
LH: loop header
LB: loop body
LE: loop exit
PB: predicated region body
PF: predicated region fallthrough
CT: control target
= control target key end

     0   :  { %vm25_vm0 = vcmask 261120   ;;  %s436_s0 = inlined_call_operand.vmem [shape: f32[16,32], index: 0, kind: input, shape index: {}]   ;;  %s437_s1 = inlined_call_operand.vmem [shape: f32[32,64], index: 1, kind: input, shape index: {}]   ;;  %s438_s2 = inlined_call_operand.vmem [shape: f32[1,64], index: 2, kind: input, shape index: {}]   ;;  %s439_s3 = inlined_call_operand.vmem [shape: f32[64,32], index: 3, kind: input, shape index: {}]   ;;  %s440_s4 = inlined_call_operand.vmem [shape: f32[1,32], index: 4, kind: input, shape index: {}]   ;;  %s441_s5 = inlined_call_operand.hbm [shape: f32[16,32], index: 5, kind: output, shape index: {}]  }
   0x1   :  { %v33_v0 = vld [vmem:[%s437_s1 + $0x18] sm:$0xff]  ;;  %v32_v1 = vld [vmem:[%s437_s1 + $0x10] sm:$0xff]  ;;  %v28_v2 = vld [vmem:[%s436_s0] sm:$0xff] }
   0x2   :  { %283 = vmatprep.subr.mxu0 %v33_v0  ;;  %v31_v3 = vld [vmem:[%s437_s1 + $0x8] sm:$0xff]  ;;  %291 = vmatprep.mubr.msk.f32.mxu0 %vm25_vm0, %v28_v2 }
   0x3   :  { %284 = vmatpush3.msra.mxu0 %v33_v0 }
   0x4   :  { %10 = vsyncpa [#allocation4], 0  ;;  %285 = vmatprep.subr.mxu0 %v32_v1  ;;  %v30_v4 = vld [vmem:[%s437_s1] sm:$0xff]  ;;  %v29_v5 = vld [vmem:[%s436_s0 + $0x8] sm:$0xff]  ;;  %v343_v14 = vmov 0.0   ;;  %vm143_vm1 = vcmask 523264  }
   0x5   :  { %286 = vmatpush3.msra.mxu0 %v32_v1  ;;  %v142_v6 = vld [vmem:[%s439_s3 + $0x38] sm:$0xff]  ;;  %v141_v7 = vld [vmem:[%s439_s3 + $0x30] sm:$0xff]  ;;  %v140_v8 = vld [vmem:[%s439_s3 + $0x28] sm:$0xff]  ;;  %27 = vst.msk [vmem:[#allocation2 + $0x8] sm:$0xff] %vm25_vm0, %v343_v14  ;;  %s344_s21 = smov [#allocation3]  }
   0x6   :  { %287 = vmatprep.subr.mxu0 %v31_v3  ;;  %294 = vmatprep.subr.mxu1 %v142_v6  ;;  %v139_v9 = vld [vmem:[%s439_s3 + $0x20] sm:$0xff]  ;;  %v138_v10 = vld [vmem:[%s439_s3 + $0x18] sm:$0xff]  ;;  %v137_v11 = vld [vmem:[%s439_s3 + $0x10] sm:$0xff]  ;;  %26 = vst.msk [vmem:[#allocation2] sm:$0xff] %vm25_vm0, %v343_v14  ;;  %s250_s22 = sshll.u32 %s344_s21, 4  ;;  %s251_s22 = int_to_ptr.vmem [resolvable:$true] %s250_s22 }
   0x7   :  { %288 = vmatpush3.msra.mxu0 %v31_v3  ;;  %295 = vmatpush3.msra.mxu1 %v142_v6  ;;  %v136_v12 = vld [vmem:[%s439_s3 + $0x8] sm:$0xff]  ;;  %v135_v13 = vld [vmem:[%s439_s3] sm:$0xff]  ;;  %s321_s23 = scalar_lea.vmem %s251_s22, 256  ;;  %p326_p1 = scmp.lt.s32.totalorder %s251_s22, %s251_s22 }
   0x8   :  { %289 = vmatprep.subr.mxu0 %v30_v4  ;;  %296 = vmatprep.subr.mxu1 %v141_v7  ;;  %v261_v15 = vld [vmem:[%s438_s2] ss:$0 sm:$0xff]  ;;  %p322_p0 = scmp.ne.s32.totalorder %s251_s22, %s321_s23  ;;  %p327_p2 = scmp.lt.s32.totalorder %s321_s23, %s321_s23 }
   0x9   :  { %290 = vmatpush3.msra.mxu0 %v30_v4  ;;  %297 = vmatpush3.msra.mxu1 %v141_v7  ;;  %v266_v36 = vld [vmem:[%s440_s4] ss:$0 sm:$0xff] }
   0xa   :  { %292 = vmatmul.mubr.msk.f32.vlgmr.msra.gmra.mxu0 %vm25_vm0, %v29_v5  ;;  %298 = vmatprep.subr.mxu1 %v140_v8  ;;  %p328_p3 = por %p327_p2, %p326_p1 }
   0xb   :  { %299 = vmatpush3.msra.mxu1 %v140_v8 }
   0xc   :  { %300 = vmatprep.subr.mxu1 %v139_v9  ;;  %v134_v30 = vld [vmem:[#allocation2 + $0x8] sm:$0xff]  ;;  %p329_p4 = pnand %p328_p3, %p322_p0 }
   0xd   :  { %301 = vmatpush3.msra.mxu1 %v139_v9  ;;  %v133_v32 = vld [vmem:[#allocation2] sm:$0xff] }
   0xe   :  { %302 = vmatprep.subr.mxu1 %v138_v10 }
   0xf   :  { %303 = vmatpush3.msra.mxu1 %v138_v10 }
  0x10   :  { %304 = vmatprep.subr.mxu1 %v137_v11 }
  0x11   :  { %305 = vmatpush3.msra.mxu1 %v137_v11 }
  0x12   :  { %306 = vmatprep.subr.mxu1 %v136_v12 }
  0x13   :  { %307 = vmatpush3.msra.mxu1 %v136_v12 }
  0x14   :  { %308 = vmatprep.subr.mxu1 %v135_v13 }
  0x15   :  { %309 = vmatpush3.msra.mxu1 %v135_v13 }
  0xca   :  { %v293_v16 = vpop.f32.mrf.mxu0 }
  0xcb   :  { %v120_v17 = vadd.f32 %v293_v16, %v261_v15 }
  0xcc   :  { %v114_v18 = vpop.f32.mrf.mxu0 }
  0xcd   :  { %v126_v19 = vmul.f32 0.70710677, %v120_v17  ;;  %v115_v20 = vadd.f32 %v261_v15, %v114_v18  ;;  %v124_v27 = vmul.f32 0.5, %v120_v17 }
  0xcf   :  { %317 = verf.f32 %v126_v19  ;;  %v125_v21 = vmul.f32 0.70710677, %v115_v20  ;;  %v123_v25 = vmul.f32 0.5, %v115_v20 }
  0xd1   :  { %319 = verf.f32 %v125_v21 }
  0xdc   :  { %v318_v22 = vpop.eup %317 }
  0xdd   :  { %v130_v24 = vadd.f32 1.0, %v318_v22 }
  0xde   :  { %v320_v23 = vpop.eup %319 }
  0xdf   :  { %v129_v26 = vadd.f32 1.0, %v320_v23  ;;  %v132_v29 = vmul.f32 %v130_v24, %v124_v27 }
  0xe1   :  { %v131_v28 = vmul.f32 %v129_v26, %v123_v25 }
  0xe3   :  { %310 = vmatprep.mubr.msk.f32.mxu1 %vm143_vm1, %v131_v28 }
  0xe4   :  { %311 = vmatmul.mubr.msk.f32.vlgmr.msra.gmra.mxu1 %vm143_vm1, %v132_v29 }
 0x1a4   :  { %v312_v31 = vpop.f32.mrf.mxu1 }
 0x1a5   :  { %v226_v33 = vadd.f32 %v312_v31, %v134_v30 }
 0x1a6   :  { %v216_v34 = vpop.f32.mrf.mxu1 }
 0x1a7   :  { %228 = vst.msk [vmem:[#allocation2 + $0x8] sm:$0xff] %vm25_vm0, %v226_v33  ;;  %v225_v35 = vadd.f32 %v216_v34, %v133_v32 }
 0x1a9   :  { %227 = vst.msk [vmem:[#allocation2] sm:$0xff] %vm25_vm0, %v225_v35 }
 0x1ae   :  { %v233_v37 = vld [vmem:[#allocation2 + $0x8] sm:$0xff] }
 0x1af   :  { %v242_v38 = vadd.f32 %v266_v36, %v233_v37 }
 0x1b0   :  { %v232_v39 = vld [vmem:[#allocation2] sm:$0xff] }
 0x1b1   :  { %v241_v40 = vadd.f32 %v266_v36, %v232_v39  ;;  %244 = vst.msk [vmem:[#allocation3 + $0x8] sm:$0xff] %vm25_vm0, %v242_v38 }
 0x1b3   :  { %243 = vst.msk [vmem:[#allocation3] sm:$0xff] %vm25_vm0, %v241_v40 }
 0x1b4   :  { %332 = shalt.err (!%p329_p4)
}
 0x1b5   :  { %s345_s24 = smov 128   ;;  %s346_s4 = smov 8  }
 0x1b6   :  { %256 = dma.vmem_to_hbm [thread:$0]  %s251_s22, 256, %s441_s5, [#allocation4], %s345_s24, %s345_s24, %s346_s4  }
 0x1b7   :  { %341 = dma.done.wait [#allocation4], 256  }
 0x1b8   :  { %342 = vsyncadd [#allocation4], 4294967040 }
 0x1b9   :  { %260 = vsyncpa [#allocation4], 1 }

</bundles_post_ra>
